<compile_context>
chip_gen: v7x
topology: tpu7x:2x2x1
jax: 0.10.0
libtpu: 0.0.40
codegen_flags: <defaults>
</compile_context>

<pallas_src>
import jax
import jax.numpy as jnp
from jax.experimental import pallas as pl
from jax.experimental.pallas import tpu as pltpu


def linear_block_kernel(x_ref, w_ref, gb_ref, o_ref, acc_ref):
    k = pl.program_id(1)

    @pl.when(k == 0)
    def _():
        acc_ref[...] = jnp.zeros_like(acc_ref)

    # ---- Linear (bias omitted: cancelled by BatchNorm's mean subtraction) ----
    acc_ref[...] += jnp.dot(
        x_ref[...], w_ref[...], preferred_element_type=jnp.float32
    )

    @pl.when(k == pl.num_programs(1) - 1)
    def _():
        # ---- BatchNorm1d (training mode: batch stats, biased variance) ----
        y = acc_ref[...]
        mean = jnp.mean(y, axis=0, keepdims=True)          # (1, tn)
        centered = y - mean
        var = jnp.mean(centered * centered, axis=0, keepdims=True)
        y_bn = (centered * jax.lax.rsqrt(var + 1e-5)) * gb_ref[0:1, :] \
               + gb_ref[1:2, :]
        # ---- LeakyReLU(0.2): single VALU max per vreg ----
        o_ref[...] = jnp.maximum(y_bn, 0.2 * y_bn).astype(o_ref.dtype)


def _round_up(v, m):
    return (v + m - 1) // m * m


def _pick_tile(dim, candidates=(512, 256, 128)):
    """Largest 128-multiple tile that divides `dim`, else the full extent."""
    for c in candidates:
        if dim % c == 0:
            return c
    return dim  # single full-extent block (allowed by BlockSpec rules)


def linear_block(x, w, b, gamma, beta):
    """x: (B, in_f) f32; w: (out_f, in_f); b, gamma, beta: (out_f,).

    `b` is accepted for API parity with nn.Linear but is mathematically a
    no-op under training-mode BatchNorm (mean subtraction cancels it).
    """
    del b
    B, in_f = x.shape
    out_f = w.shape[0]

    # ---- wrapper-side layout prep (plain XLA ops, run once) ----
    out_f_p = _round_up(out_f, 128)                     # lane-dense stores
    w_t = jnp.zeros((in_f, out_f_p), dtype=w.dtype).at[:, :out_f].set(w.T)
    gb = jnp.concatenate(
        [jnp.ones((1, out_f_p), jnp.float32).at[0, :out_f].set(gamma),
         jnp.zeros((1, out_f_p), jnp.float32).at[0, :out_f].set(beta)],
        axis=0,
    )

    tn = _pick_tile(out_f_p)            # feature (lane) tile, multiple of 128
    tk = _pick_tile(in_f)               # contraction tile
    nj, nk = out_f_p // tn, in_f // tk

    out = pl.pallas_call(
        linear_block_kernel,
        out_shape=jax.ShapeDtypeStruct((B, out_f_p), x.dtype),
        grid_spec=pltpu.PrefetchScalarGridSpec(
            num_scalar_prefetch=0,
            grid=(nj, nk),                                    # reduction last
            in_specs=[
                pl.BlockSpec((B, tk), lambda j, k: (0, k)),   # x (full batch)
                pl.BlockSpec((tk, tn), lambda j, k: (k, j)),  # W^T tile
                pl.BlockSpec((2, tn), lambda j, k: (0, j)),   # [gamma; beta]
            ],
            out_specs=pl.BlockSpec((B, tn), lambda j, k: (0, j)),
            scratch_shapes=[pltpu.VMEM((B, tn), jnp.float32)],  # f32 accum
        ),
        compiler_params=pltpu.CompilerParams(
            # Feature tiles are independent -> parallel (megacore on v7x);
            # K accumulates into the resident output/scratch -> arbitrary.
            dimension_semantics=("parallel", "arbitrary"),
            vmem_limit_bytes=32 * 1024 * 1024,   # v7x-safe (64 MiB physical)
        ),
    )(x, w_t, gb)
    return out[:, :out_f]


def reference(x, w, b, gamma, beta):
    y = x @ w.T + b
    mean = y.mean(axis=0, keepdims=True)
    var = ((y - mean) ** 2).mean(axis=0, keepdims=True)
    y = (y - mean) / jnp.sqrt(var + 1e-5) * gamma + beta
    return jnp.where(y >= 0, y, 0.2 * y)


if __name__ == "__main__":
    B, in_features, out_features = 8, 16, 32

    key = jax.random.PRNGKey(0)
    kx, kw, kb = jax.random.split(key, 3)

    x = jax.random.normal(kx, (B, in_features), dtype=jnp.float32)

    # Deterministic parameter init (PyTorch-Linear-like uniform bound).
    bound = 1.0 / (in_features ** 0.5)
    w = jax.random.uniform(kw, (out_features, in_features),
                           minval=-bound, maxval=bound, dtype=jnp.float32)
    b = jax.random.uniform(kb, (out_features,),
                           minval=-bound, maxval=bound, dtype=jnp.float32)
    gamma = jnp.ones((out_features,), dtype=jnp.float32)   # BatchNorm1d default
    beta = jnp.zeros((out_features,), dtype=jnp.float32)   # BatchNorm1d default

    out = linear_block(x, w, b, gamma, beta)
    out = jax.block_until_ready(out)

    ref = reference(x, w, b, gamma, beta)
    assert out.shape == (B, out_features)
    assert jnp.allclose(out, ref, atol=1e-4, rtol=1e-4), "mismatch vs reference"

    print("KERNEL_OK")
</pallas_src>

<mosaic_0001>
module attributes {stable_mosaic.version = 11 : i64} {
  func.func @linear_block_kernel(%arg0: i32, %arg1: i32, %arg2: memref<8x16xf32, #tpu.memory_space<vmem>>, %arg3: memref<16x128xf32, #tpu.memory_space<vmem>>, %arg4: memref<2x128xf32, #tpu.memory_space<vmem>>, %arg5: memref<8x128xf32, #tpu.memory_space<vmem>>, %arg6: memref<8x128xf32, #tpu.memory_space<vmem>>) attributes {dimension_semantics = [#tpu.dimension_semantics<parallel>, #tpu.dimension_semantics<arbitrary>], iteration_bounds = array<i64: 1, 1>, scalar_prefetch = 0 : i64, scratch_operands = 1 : i64, tpu.core_type = #tpu.core_type<tc>, window_params = [{transform_indices = @transform_0, window_bounds = array<i64: 8, 16>}, {transform_indices = @transform_1, window_bounds = array<i64: 16, 128>}, {transform_indices = @transform_2, window_bounds = array<i64: 2, 128>}, {transform_indices = @transform_3, window_bounds = array<i64: 8, 128>}]} {
    %c0_i32 = arith.constant 0 : i32
    %0 = arith.cmpi eq, %arg1, %c0_i32 : i32
    %1 = arith.extui %0 : i1 to i32
    %c0_i32_0 = arith.constant 0 : i32
    %2 = arith.cmpi ne, %1, %c0_i32_0 : i32
    scf.if %2 {
      %cst_10 = arith.constant 0.000000e+00 : f32
      %12 = vector.broadcast %cst_10 : f32 to vector<8x128xf32>
      %c0_11 = arith.constant 0 : index
      %c0_12 = arith.constant 0 : index
      %13 = vector.load %arg6[%c0_11, %c0_12] : memref<8x128xf32, #tpu.memory_space<vmem>>, vector<8x128xf32>
      tpu.vector_store %arg6[%c0_11, %c0_12], %12 {strides = array<i32>} : memref<8x128xf32, #tpu.memory_space<vmem>>, vector<8x128xf32>,
    } else {
    }
    %c0 = arith.constant 0 : index
    %c0_1 = arith.constant 0 : index
    %3 = vector.load %arg6[%c0, %c0_1] : memref<8x128xf32, #tpu.memory_space<vmem>>, vector<8x128xf32>
    %c0_2 = arith.constant 0 : index
    %c0_3 = arith.constant 0 : index
    %4 = vector.load %arg2[%c0_2, %c0_3] : memref<8x16xf32, #tpu.memory_space<vmem>>, vector<8x16xf32>
    %c0_4 = arith.constant 0 : index
    %c0_5 = arith.constant 0 : index
    %5 = vector.load %arg3[%c0_4, %c0_5] : memref<16x128xf32, #tpu.memory_space<vmem>>, vector<16x128xf32>
    %cst = arith.constant dense<0.000000e+00> : vector<8x128xf32>
    %6 = tpu.matmul %4, %5, %cst {dimension_numbers = #tpu.dot_dimension_numbers<[1], [0], [0], [1], [0, 0, 1, 1], [], []>} : vector<8x16xf32>, vector<16x128xf32>, vector<8x128xf32> -> vector<8x128xf32>
    %7 = arith.addf %3, %6 : vector<8x128xf32>
    %c0_6 = arith.constant 0 : index
    %c0_7 = arith.constant 0 : index
    %8 = vector.load %arg6[%c0_6, %c0_7] : memref<8x128xf32, #tpu.memory_space<vmem>>, vector<8x128xf32>
    tpu.vector_store %arg6[%c0_6, %c0_7], %7 {strides = array<i32>} : memref<8x128xf32, #tpu.memory_space<vmem>>, vector<8x128xf32>,
    %c0_i32_8 = arith.constant 0 : i32
    %9 = arith.cmpi eq, %arg1, %c0_i32_8 : i32
    %10 = arith.extui %9 : i1 to i32
    %c0_i32_9 = arith.constant 0 : i32
    %11 = arith.cmpi ne, %10, %c0_i32_9 : i32
    scf.if %11 {
      %c0_10 = arith.constant 0 : index
      %c0_11 = arith.constant 0 : index
      %12 = vector.load %arg6[%c0_10, %c0_11] : memref<8x128xf32, #tpu.memory_space<vmem>>, vector<8x128xf32>
      %cst_12 = arith.constant dense<0.000000e+00> : vector<128xf32>
      %13 = vector.multi_reduction <add>, %12, %cst_12 [0] : vector<8x128xf32> to vector<128xf32>
      %14 = vector.shape_cast %13 : vector<128xf32> to vector<1x128xf32>
      %cst_13 = arith.constant 8.000000e+00 : f32
      %15 = vector.broadcast %cst_13 : f32 to vector<1x128xf32>
      %16 = arith.divf %14, %15 : vector<1x128xf32>
      %17 = vector.broadcast %16 : vector<1x128xf32> to vector<8x128xf32>
      %18 = arith.subf %12, %17 : vector<8x128xf32>
      %19 = arith.mulf %18, %18 : vector<8x128xf32>
      %cst_14 = arith.constant dense<0.000000e+00> : vector<128xf32>
      %20 = vector.multi_reduction <add>, %19, %cst_14 [0] : vector<8x128xf32> to vector<128xf32>
      %21 = vector.shape_cast %20 : vector<128xf32> to vector<1x128xf32>
      %cst_15 = arith.constant 8.000000e+00 : f32
      %22 = vector.broadcast %cst_15 : f32 to vector<1x128xf32>
      %23 = arith.divf %21, %22 : vector<1x128xf32>
      %cst_16 = arith.constant 9.99999974E-6 : f32
      %24 = vector.broadcast %cst_16 : f32 to vector<1x128xf32>
      %25 = arith.addf %23, %24 : vector<1x128xf32>
      %26 = math.rsqrt %25 : vector<1x128xf32>
      %27 = vector.broadcast %26 : vector<1x128xf32> to vector<8x128xf32>
      %28 = arith.mulf %18, %27 : vector<8x128xf32>
      %c0_17 = arith.constant 0 : index
      %c0_18 = arith.constant 0 : index
      %29 = vector.load %arg4[%c0_17, %c0_18] : memref<2x128xf32, #tpu.memory_space<vmem>>, vector<1x128xf32>
      %30 = vector.broadcast %29 : vector<1x128xf32> to vector<8x128xf32>
      %31 = arith.mulf %28, %30 : vector<8x128xf32>
      %c1 = arith.constant 1 : index
      %c0_19 = arith.constant 0 : index
      %32 = vector.load %arg4[%c1, %c0_19] : memref<2x128xf32, #tpu.memory_space<vmem>>, vector<1x128xf32>
      %33 = vector.broadcast %32 : vector<1x128xf32> to vector<8x128xf32>
      %34 = arith.addf %31, %33 : vector<8x128xf32>
      %cst_20 = arith.constant 2.000000e-01 : f32
      %35 = vector.broadcast %cst_20 : f32 to vector<8x128xf32>
      %36 = arith.mulf %35, %34 : vector<8x128xf32>
      %37 = arith.maximumf %34, %36 : vector<8x128xf32>
      %c0_21 = arith.constant 0 : index
      %c0_22 = arith.constant 0 : index
      %38 = vector.load %arg5[%c0_21, %c0_22] : memref<8x128xf32, #tpu.memory_space<vmem>>, vector<8x128xf32>
      tpu.vector_store %arg5[%c0_21, %c0_22], %37 {strides = array<i32>} : memref<8x128xf32, #tpu.memory_space<vmem>>, vector<8x128xf32>,
    } else {
    }
    return
  }
  func.func @transform_0(%arg0: i32, %arg1: i32) -> (i32, i32) {
    %c0_i32 = arith.constant 0 : i32
    %c0_i32_0 = arith.constant 0 : i32
    return %c0_i32, %arg1 : i32, i32
  }
  func.func @transform_1(%arg0: i32, %arg1: i32) -> (i32, i32) {
    %c0_i32 = arith.constant 0 : i32
    return %arg1, %arg0 : i32, i32
  }
  func.func @transform_2(%arg0: i32, %arg1: i32) -> (i32, i32) {
    %c0_i32 = arith.constant 0 : i32
    %c0_i32_0 = arith.constant 0 : i32
    return %c0_i32, %arg0 : i32, i32
  }
  func.func @transform_3(%arg0: i32, %arg1: i32) -> (i32, i32) {
    %c0_i32 = arith.constant 0 : i32
    %c0_i32_0 = arith.constant 0 : i32
    return %c0_i32, %arg0 : i32, i32
  }
}

</mosaic_0001>

<bundles_post_ra>
// kernel: tpu_custom_call.1
= control target key start
LH: loop header
LB: loop body
LE: loop exit
PB: predicated region body
PF: predicated region fallthrough
CT: control target
= control target key end

     0   :  { %8 = vsyncpa [#allocation4], 0  ;;  %s356_s0 = inlined_call_operand.hbm [shape: f32[8,16], index: 0, kind: input, shape index: {}]   ;;  %s357_s1 = inlined_call_operand.hbm [shape: f32[16,128], index: 1, kind: input, shape index: {}]   ;;  %s358_s2 = inlined_call_operand.vmem [shape: f32[2,128], index: 2, kind: input, shape index: {}]   ;;  %s359_s3 = inlined_call_operand.hbm [shape: f32[8,128], index: 3, kind: output, shape index: {}]  }
   0x1   :  { %9 = vsyncpa [#allocation7], 0 }
   0x2   :  { %10 = vsyncpa [#allocation5], 0  ;;  %s279_s12 = smov [#allocation3]   ;;  %s280_s14 = smov [#allocation6]  }
   0x3   :  { %s17_s13 = sshll.u32 %s279_s12, 4  ;;  %s26_s15 = sshll.u32 %s280_s14, 4  ;;  %s18_s13 = int_to_ptr.vmem [resolvable:$true] %s17_s13  ;;  %s307_s15 = int_to_ptr.vmem [resolvable:$true] %s26_s15 }
   0x4   :  { %s207_s18 = scalar_lea.hbm %s356_s0, 128 }
   0x5   :  { %p208_p0 = scmp.ne.s32.totalorder %s356_s0, %s207_s18  ;;  %p211_p1 = scmp.lt.u32.totalorder %s207_s18, %s356_s0 }
   0x7   :  { %p213_p2 = pnand %p211_p1, %p208_p0 }
   0x9   :  { %216 = shalt.err (!%p213_p2)
}
   0xa   :  { %s217_s23 = scalar_lea.vmem %s18_s13, 128  ;;  %p222_p4 = scmp.lt.s32.totalorder %s18_s13, %s18_s13 }
   0xb   :  { %p218_p3 = scmp.ne.s32.totalorder %s18_s13, %s217_s23  ;;  %p223_p5 = scmp.lt.s32.totalorder %s217_s23, %s217_s23 }
   0xd   :  { %p224_p6 = por %p223_p5, %p222_p4 }
   0xf   :  { %p225_p7 = pnand %p224_p6, %p218_p3 }
  0x11   :  { %228 = shalt.err (!%p225_p7)
}
  0x12   :  { %20 = dma.hbm_to_vmem [thread:$0]  %s356_s0, 128, %s18_s13, [#allocation4]  }
  0x13   :  { %s229_s28 = scalar_lea.hbm %s357_s1, 256 }
  0x14   :  { %p230_p8 = scmp.ne.s32.totalorder %s357_s1, %s229_s28  ;;  %p233_p9 = scmp.lt.u32.totalorder %s229_s28, %s357_s1 }
  0x16   :  { %p235_p10 = pnand %p233_p9, %p230_p8 }
  0x18   :  { %238 = shalt.err (!%p235_p10)
}
  0x19   :  { %s239_s6 = scalar_lea.vmem %s307_s15, 256  ;;  %p244_p12 = scmp.lt.s32.totalorder %s307_s15, %s307_s15 }
  0x1a   :  { %p240_p11 = scmp.ne.s32.totalorder %s307_s15, %s239_s6  ;;  %p245_p13 = scmp.lt.s32.totalorder %s239_s6, %s239_s6 }
  0x1c   :  { %p246_p0 = por %p245_p13, %p244_p12 }
  0x1e   :  { %p247_p1 = pnand %p246_p0, %p240_p11 }
  0x20   :  { %250 = shalt.err (!%p247_p1)
}
  0x21   :  { %s281_s0 = smov 128   ;;  %s282_s7 = smov 8  }
  0x22   :  { %32 = dma.hbm_to_vmem [thread:$0]  %s357_s1, 256, %s307_s15, [#allocation7], %s281_s0, %s281_s0, %s282_s7  }
  0x23   :  { %273 = dma.done.wait [#allocation4], 128  }
  0x24   :  { %274 = vsyncadd [#allocation4], 4294967168 }
  0x25   :  { %275 = dma.done.wait [#allocation7], 256  }
  0x26   :  { %276 = vsyncadd [#allocation7], 4294967040  ;;  %v283_v0 = vmov 0.0|0.0   ;;  %vm284_vm0 = vmmov 0   ;;  %v285_v1 = vmov 0.0   ;;  %v48_v2 = vld [vmem:[#allocation6] sm:$0xff] }
  0x27   :  { %194 = vmatprep.subr.bf16.mxu0 %v283_v0  ;;  %191 = vmatprep.mubr.msk.f32.mxu0 %vm284_vm0, %v285_v1  ;;  %v49_v3 = vld [vmem:[#allocation6 + $0x8] sm:$0xff]  ;;  %v47_v5 = vld [vmem:[#allocation3] sm:$0xff]  ;;  %vm50_vm1 = vcmask 130048   ;;  %s286_s13 = smov [#allocation8]  }
  0x28   :  { %v195_v4 = vpack.c.bf16 %v49_v3, %v48_v2  ;;  %v182_v26 = vld [vmem:[%s358_s2] ss:$0 sm:$0xff]  ;;  %v183_v28 = vld [vmem:[%s358_s2 + $0x1] ss:$0 sm:$0xff]  ;;  %s171_s14 = sshll.u32 %s286_s13, 4  ;;  %s172_s14 = int_to_ptr.vmem [resolvable:$true] %s171_s14 }
  0x29   :  { %s251_s15 = scalar_lea.vmem %s172_s14, 128  ;;  %p256_p3 = scmp.lt.s32.totalorder %s172_s14, %s172_s14 }
  0x2a   :  { %196 = vmatpush3.bf16.msra.mxu0 %v195_v4  ;;  %p252_p2 = scmp.ne.s32.totalorder %s172_s14, %s251_s15  ;;  %p257_p4 = scmp.lt.s32.totalorder %s251_s15, %s251_s15 }
  0x2c   :  { %p258_p5 = por %p257_p4, %p256_p3 }
  0x2d   :  { %192 = vmatmul.mubr.msk.f32.vlgmr.msra.gmra.mrb[0].mxu0 %vm50_vm1, %v47_v5 }
  0x2e   :  { %p259_p6 = pnand %p258_p5, %p252_p2 }
 0x100   :  { %v120_v6 = vpop.f32.mrb[0].mxu0 }
 0x101   :  { %v130_v7 = vrot.slane %v120_v6, 4  ;;  %v193_v8 = vpop.f32.mrb[1].mxu0 }
 0x103   :  { %v131_v9 = vadd.f32 %v130_v7, %v120_v6 }
 0x105   :  { %v132_v10 = vrot.slane %v131_v9, 2 }
 0x107   :  { %v133_v11 = vadd.f32 %v132_v10, %v131_v9 }
 0x109   :  { %v134_v12 = vrot.slane %v133_v11, 1 }
 0x10b   :  { %v135_v13 = vadd.f32 %v134_v12, %v133_v11 }
 0x10d   :  { %v137_v14 = vmul.f32 0.125, %v135_v13 }
 0x10f   :  { %v138_v15 = vsub.f32 %v120_v6, %v137_v14 }
 0x111   :  { %v139_v16 = vmul.f32 %v138_v15, %v138_v15 }
 0x113   :  { %v140_v17 = vrot.slane %v139_v16, 4 }
 0x115   :  { %v141_v18 = vadd.f32 %v140_v17, %v139_v16 }
 0x117   :  { %v142_v19 = vrot.slane %v141_v18, 2 }
 0x119   :  { %v143_v20 = vadd.f32 %v142_v19, %v141_v18 }
 0x11b   :  { %v144_v21 = vrot.slane %v143_v20, 1 }
 0x11d   :  { %v145_v22 = vadd.f32 %v144_v21, %v143_v20 }
 0x11f   :  { %v146_v23 = vmul.f32 0.125, %v145_v22 }
 0x121   :  { %v147_v24 = vadd.f32 1e-05, %v146_v23 }
 0x123   :  { %205 = vrsqrt.f32 %v147_v24 }
 0x12d   :  { %v206_v25 = vpop.eup %205 }
 0x12e   :  { %v149_v27 = vmul.f32 %v206_v25, %v138_v15 }
 0x130   :  { %v155_v29 = vmul.f32 %v182_v26, %v149_v27 }
 0x132   :  { %v161_v30 = vadd.f32 %v183_v28, %v155_v29 }
 0x134   :  { %v162_v31 = vmul.f32 0.2, %v161_v30 }
 0x136   :  { %v163_v32 = vmax.f32 %v161_v30, %v162_v31 }
 0x138   :  { %164 = vst [vmem:[#allocation8] sm:$0xff] %v163_v32 }
 0x139   :  { %262 = shalt.err (!%p259_p6)
}
 0x13a   :  { %s263_s18 = scalar_lea.hbm %s359_s3, 128 }
 0x13b   :  { %p264_p7 = scmp.ne.s32.totalorder %s359_s3, %s263_s18  ;;  %p267_p8 = scmp.lt.u32.totalorder %s263_s18, %s359_s3 }
 0x13d   :  { %p269_p9 = pnand %p267_p8, %p264_p7 }
 0x13f   :  { %272 = shalt.err (!%p269_p9)
}
 0x140   :  { %174 = dma.vmem_to_hbm [thread:$0]  %s172_s14, 128, %s359_s3, [#allocation5]  }
 0x141   :  { %277 = dma.done.wait [#allocation5], 128  }
 0x142   :  { %278 = vsyncadd [#allocation5], 4294967168 }
 0x143   :  { %178 = vsyncpa [#allocation4], 1 }
 0x144   :  { %179 = vsyncpa [#allocation7], 1 }
 0x145   :  { %180 = vsyncpa [#allocation5], 1 }

</bundles_post_ra>
